<compile_context>
chip_gen: v6e
topology: v6e:2x2x1
jax: 0.10.0
libtpu: 0.0.40
codegen_flags: <defaults>
</compile_context>

<pallas_src>
import jax
import jax.numpy as jnp
from jax.experimental import pallas as pl
from jax.experimental.pallas import tpu as pltpu


def _sp2x2_kernel(xp_ref, w_ref, b_ref, o_ref):
    """Fused im2col + GEMM + bias for one batch element.

    xp_ref: (1, H+1, W+1, C)  shifted-pad input, NHWC, f32
    w_ref : (4, C, C2)        conv weight per tap, tap order (0,0),(0,1),(1,0),(1,1), f32
    b_ref : (C2, 1)           bias, f32
    o_ref : (1, C2, H*W)      output, channel-major (= NCHW, flattened), f32
    """
    _, hp1, wp1, c = xp_ref.shape
    h, w = hp1 - 1, wp1 - 1
    hw = h * w

    xp = xp_ref[0]                                   # (H+1, W+1, C) in VMEM

    # Four conv taps as static shifted slices; each is reshaped with a
    # leading-dims collapse only (last dim unchanged) -> cheap on TPU.
    t00 = xp[:h, :w, :].reshape(hw, c)               # tap (kh=0, kw=0)
    t01 = xp[:h, 1:, :].reshape(hw, c)               # tap (0, 1)
    t10 = xp[1:, :w, :].reshape(hw, c)               # tap (1, 0)
    t11 = xp[1:, 1:, :].reshape(hw, c)               # tap (1, 1)

    # Sum of 4 small MXU matmuls, f32 accumulation.  (H*W, C) @ (C, C2).
    acc = jnp.dot(t00, w_ref[0], preferred_element_type=jnp.float32)
    acc += jnp.dot(t01, w_ref[1], preferred_element_type=jnp.float32)
    acc += jnp.dot(t10, w_ref[2], preferred_element_type=jnp.float32)
    acc += jnp.dot(t11, w_ref[3], preferred_element_type=jnp.float32)

    # Transpose the small accumulator so stores are lane-dense (H*W lanes) and
    # the result is already NCHW -- no XLA output transpose needed.
    o_ref[0] = (acc.T + b_ref[...]).astype(o_ref.dtype)     # (C2, H*W)


def sp2x2_forward(x, weight, bias):
    """x: (n, c, h, w) NCHW f32; weight: (c2, c, 2, 2); bias: (c2,) -> (n, c2, h, w)."""
    n, c, h, w = x.shape
    assert c % 4 == 0, "sp2x2 requires in_channels % 4 == 0"
    c2 = weight.shape[0]
    c4 = c // 4

    # Per-group corner zero-padding (matches F.pad(..., (wl, wr, ht, hb))),
    # then NCHW -> NHWC.  This is one cheap fused XLA pass over the input; the
    # heavy lifting (im2col taps, GEMM, bias, output layout) is in the kernel.
    x1 = jnp.pad(x[:, :c4],           ((0, 0), (0, 0), (1, 0), (1, 0)))
    x2 = jnp.pad(x[:, c4:2 * c4],     ((0, 0), (0, 0), (1, 0), (0, 1)))
    x3 = jnp.pad(x[:, 2 * c4:3 * c4], ((0, 0), (0, 0), (0, 1), (1, 0)))
    x4 = jnp.pad(x[:, 3 * c4:],       ((0, 0), (0, 0), (0, 1), (0, 1)))
    xp = jnp.concatenate([x1, x2, x3, x4], axis=1)              # (n, c, h+1, w+1)
    xp = jnp.transpose(xp, (0, 2, 3, 1)).astype(jnp.float32)    # (n, h+1, w+1, c)

    # Weight: (c2, c, 2, 2) -> (4, c, c2), tap index kh-major then kw, so it
    # matches the t00/t01/t10/t11 order used inside the kernel.
    wm = jnp.transpose(weight, (2, 3, 1, 0)).reshape(4, c, c2).astype(jnp.float32)
    bm = bias.reshape(c2, 1).astype(jnp.float32)

    hw = h * w
    out = pl.pallas_call(
        _sp2x2_kernel,
        out_shape=jax.ShapeDtypeStruct((n, c2, hw), jnp.float32),
        grid_spec=pltpu.PrefetchScalarGridSpec(
            num_scalar_prefetch=0,
            grid=(n,),                           # >= 2 steps keeps both v7x TCs busy
            in_specs=[
                # One full padded image per grid step; im2col stays in VMEM.
                # TODO(synk): for very large h*w, tile rows with manual
                # overlapping-row DMA (memory_space=pl.ANY + make_async_copy).
                pl.BlockSpec((1, h + 1, w + 1, c), lambda i: (i, 0, 0, 0)),
                pl.BlockSpec((4, c, c2), lambda i: (0, 0, 0)),   # weight (resident)
                pl.BlockSpec((c2, 1), lambda i: (0, 0)),         # bias (resident)
            ],
            out_specs=pl.BlockSpec((1, c2, hw), lambda i: (i, 0, 0)),
        ),
        compiler_params=pltpu.CompilerParams(
            dimension_semantics=("parallel",),
            vmem_limit_bytes=32 * 1024 * 1024,   # safe headroom on v5e/v6e/v7x
        ),
    )(xp, wm, bm)

    # (n, c2, h*w) -> (n, c2, h, w): trailing-dim split, metadata-only reshape
    # (no HBM transpose round trip).
    return out.reshape(n, c2, h, w)


def _reference(x, weight, bias):
    """Pure-JAX f32 reference (pad + lax.conv) for a correctness check."""
    n, c, h, w_ = x.shape
    c4 = c // 4
    x1 = jnp.pad(x[:, :c4],           ((0, 0), (0, 0), (1, 0), (1, 0)))
    x2 = jnp.pad(x[:, c4:2 * c4],     ((0, 0), (0, 0), (1, 0), (0, 1)))
    x3 = jnp.pad(x[:, 2 * c4:3 * c4], ((0, 0), (0, 0), (0, 1), (1, 0)))
    x4 = jnp.pad(x[:, 3 * c4:],       ((0, 0), (0, 0), (0, 1), (0, 1)))
    xp = jnp.concatenate([x1, x2, x3, x4], axis=1)
    out = jax.lax.conv_general_dilated(
        xp, weight, window_strides=(1, 1), padding="VALID",
        dimension_numbers=("NCHW", "OIHW", "NCHW"))
    return out + bias.reshape(1, -1, 1, 1)


if __name__ == "__main__":
    key = jax.random.PRNGKey(0)
    kx, kw, kb = jax.random.split(key, 3)

    n, c1, c2, h, w = 2, 4, 8, 16, 16
    x = jax.random.normal(kx, (n, c1, h, w), dtype=jnp.float32)

    # Deterministic Conv2d-style init: U(-1/sqrt(fan_in), 1/sqrt(fan_in)).
    fan_in = c1 * 2 * 2
    bound = 1.0 / (fan_in ** 0.5)
    weight = jax.random.uniform(kw, (c2, c1, 2, 2), jnp.float32, -bound, bound)
    bias = jax.random.uniform(kb, (c2,), jnp.float32, -bound, bound)

    out = jax.block_until_ready(sp2x2_forward(x, weight, bias))
    ref = jax.block_until_ready(_reference(x, weight, bias))

    assert out.shape == (n, c2, h, w), out.shape
    # Pure f32 math end-to-end -> tight tolerance vs the f32 reference.
    assert jnp.allclose(out, ref, atol=1e-4, rtol=1e-4), \
        float(jnp.max(jnp.abs(out - ref)))
    print("KERNEL_OK")
</pallas_src>

<mosaic_0001>
module attributes {stable_mosaic.version = 11 : i64} {
  func.func @_sp2x2_kernel(%arg0: i32, %arg1: memref<1x17x17x4xf32, #tpu.memory_space<vmem>>, %arg2: memref<4x4x8xf32, #tpu.memory_space<vmem>>, %arg3: memref<8x1xf32, #tpu.memory_space<vmem>>, %arg4: memref<1x8x256xf32, #tpu.memory_space<vmem>>) attributes {dimension_semantics = [#tpu.dimension_semantics<parallel>], iteration_bounds = array<i64: 2>, scalar_prefetch = 0 : i64, scratch_operands = 0 : i64, tpu.core_type = #tpu.core_type<tc>, window_params = [{transform_indices = @transform_0, window_bounds = array<i64: 1, 17, 17, 4>}, {pipeline_mode = #tpu.pipeline_mode<synchronous>, transform_indices = @transform_1, window_bounds = array<i64: 4, 4, 8>}, {pipeline_mode = #tpu.pipeline_mode<synchronous>, transform_indices = @transform_2, window_bounds = array<i64: 8, 1>}, {transform_indices = @transform_3, window_bounds = array<i64: 1, 8, 256>}]} {
    %c0 = arith.constant 0 : index
    %c0_0 = arith.constant 0 : index
    %c0_1 = arith.constant 0 : index
    %c0_2 = arith.constant 0 : index
    %0 = vector.load %arg1[%c0, %c0_0, %c0_1, %c0_2] : memref<1x17x17x4xf32, #tpu.memory_space<vmem>>, vector<1x17x17x4xf32>
    %1 = vector.shape_cast %0 : vector<1x17x17x4xf32> to vector<17x17x4xf32>
    %2 = vector.extract_strided_slice %1 {offsets = [0, 0, 0], sizes = [16, 16, 4], strides = [1, 1, 1]} : vector<17x17x4xf32> to vector<16x16x4xf32>
    %3 = vector.shape_cast %2 : vector<16x16x4xf32> to vector<256x4xf32>
    %4 = vector.extract_strided_slice %1 {offsets = [0, 1, 0], sizes = [16, 16, 4], strides = [1, 1, 1]} : vector<17x17x4xf32> to vector<16x16x4xf32>
    %5 = vector.shape_cast %4 : vector<16x16x4xf32> to vector<256x4xf32>
    %6 = vector.extract_strided_slice %1 {offsets = [1, 0, 0], sizes = [16, 16, 4], strides = [1, 1, 1]} : vector<17x17x4xf32> to vector<16x16x4xf32>
    %7 = vector.shape_cast %6 : vector<16x16x4xf32> to vector<256x4xf32>
    %8 = vector.extract_strided_slice %1 {offsets = [1, 1, 0], sizes = [16, 16, 4], strides = [1, 1, 1]} : vector<17x17x4xf32> to vector<16x16x4xf32>
    %9 = vector.shape_cast %8 : vector<16x16x4xf32> to vector<256x4xf32>
    %c0_3 = arith.constant 0 : index
    %c0_4 = arith.constant 0 : index
    %c0_5 = arith.constant 0 : index
    %10 = vector.load %arg2[%c0_3, %c0_4, %c0_5] : memref<4x4x8xf32, #tpu.memory_space<vmem>>, vector<1x4x8xf32>
    %11 = vector.shape_cast %10 : vector<1x4x8xf32> to vector<4x8xf32>
    %cst = arith.constant dense<0.000000e+00> : vector<256x8xf32>
    %12 = tpu.matmul %3, %11, %cst {dimension_numbers = #tpu.dot_dimension_numbers<[1], [0], [0], [1], [0, 0, 1, 1], [], []>} : vector<256x4xf32>, vector<4x8xf32>, vector<256x8xf32> -> vector<256x8xf32>
    %c1 = arith.constant 1 : index
    %c0_6 = arith.constant 0 : index
    %c0_7 = arith.constant 0 : index
    %13 = vector.load %arg2[%c1, %c0_6, %c0_7] : memref<4x4x8xf32, #tpu.memory_space<vmem>>, vector<1x4x8xf32>
    %14 = vector.shape_cast %13 : vector<1x4x8xf32> to vector<4x8xf32>
    %cst_8 = arith.constant dense<0.000000e+00> : vector<256x8xf32>
    %15 = tpu.matmul %5, %14, %cst_8 {dimension_numbers = #tpu.dot_dimension_numbers<[1], [0], [0], [1], [0, 0, 1, 1], [], []>} : vector<256x4xf32>, vector<4x8xf32>, vector<256x8xf32> -> vector<256x8xf32>
    %16 = arith.addf %12, %15 : vector<256x8xf32>
    %c2 = arith.constant 2 : index
    %c0_9 = arith.constant 0 : index
    %c0_10 = arith.constant 0 : index
    %17 = vector.load %arg2[%c2, %c0_9, %c0_10] : memref<4x4x8xf32, #tpu.memory_space<vmem>>, vector<1x4x8xf32>
    %18 = vector.shape_cast %17 : vector<1x4x8xf32> to vector<4x8xf32>
    %cst_11 = arith.constant dense<0.000000e+00> : vector<256x8xf32>
    %19 = tpu.matmul %7, %18, %cst_11 {dimension_numbers = #tpu.dot_dimension_numbers<[1], [0], [0], [1], [0, 0, 1, 1], [], []>} : vector<256x4xf32>, vector<4x8xf32>, vector<256x8xf32> -> vector<256x8xf32>
    %20 = arith.addf %16, %19 : vector<256x8xf32>
    %c3 = arith.constant 3 : index
    %c0_12 = arith.constant 0 : index
    %c0_13 = arith.constant 0 : index
    %21 = vector.load %arg2[%c3, %c0_12, %c0_13] : memref<4x4x8xf32, #tpu.memory_space<vmem>>, vector<1x4x8xf32>
    %22 = vector.shape_cast %21 : vector<1x4x8xf32> to vector<4x8xf32>
    %cst_14 = arith.constant dense<0.000000e+00> : vector<256x8xf32>
    %23 = tpu.matmul %9, %22, %cst_14 {dimension_numbers = #tpu.dot_dimension_numbers<[1], [0], [0], [1], [0, 0, 1, 1], [], []>} : vector<256x4xf32>, vector<4x8xf32>, vector<256x8xf32> -> vector<256x8xf32>
    %24 = arith.addf %20, %23 : vector<256x8xf32>
    %25 = tpu.transpose %24, [1, 0] : vector<256x8xf32> -> vector<8x256xf32>
    %c0_15 = arith.constant 0 : index
    %c0_16 = arith.constant 0 : index
    %26 = vector.load %arg3[%c0_15, %c0_16] : memref<8x1xf32, #tpu.memory_space<vmem>>, vector<8x1xf32>
    %27 = vector.broadcast %26 : vector<8x1xf32> to vector<8x256xf32>
    %28 = arith.addf %25, %27 : vector<8x256xf32>
    %c0_17 = arith.constant 0 : index
    %c0_18 = arith.constant 0 : index
    %c0_19 = arith.constant 0 : index
    %29 = vector.load %arg4[%c0_17, %c0_18, %c0_19] : memref<1x8x256xf32, #tpu.memory_space<vmem>>, vector<1x8x256xf32>
    %30 = vector.shape_cast %29 : vector<1x8x256xf32> to vector<8x256xf32>
    %31 = vector.shape_cast %28 : vector<8x256xf32> to vector<1x8x256xf32>
    tpu.vector_store %arg4[%c0_17, %c0_18, %c0_19], %31 {strides = array<i32>} : memref<1x8x256xf32, #tpu.memory_space<vmem>>, vector<1x8x256xf32>,
    return
  }
  func.func @transform_0(%arg0: i32) -> (i32, i32, i32, i32) {
    %c0_i32 = arith.constant 0 : i32
    %c0_i32_0 = arith.constant 0 : i32
    %c0_i32_1 = arith.constant 0 : i32
    %c0_i32_2 = arith.constant 0 : i32
    return %arg0, %c0_i32, %c0_i32_0, %c0_i32_1 : i32, i32, i32, i32
  }
  func.func @transform_1(%arg0: i32) -> (i32, i32, i32) {
    %c0_i32 = arith.constant 0 : i32
    %c0_i32_0 = arith.constant 0 : i32
    %c0_i32_1 = arith.constant 0 : i32
    %c0_i32_2 = arith.constant 0 : i32
    return %c0_i32, %c0_i32_0, %c0_i32_1 : i32, i32, i32
  }
  func.func @transform_2(%arg0: i32) -> (i32, i32) {
    %c0_i32 = arith.constant 0 : i32
    %c0_i32_0 = arith.constant 0 : i32
    %c0_i32_1 = arith.constant 0 : i32
    return %c0_i32, %c0_i32_0 : i32, i32
  }
  func.func @transform_3(%arg0: i32) -> (i32, i32, i32) {
    %c0_i32 = arith.constant 0 : i32
    %c0_i32_0 = arith.constant 0 : i32
    %c0_i32_1 = arith.constant 0 : i32
    return %arg0, %c0_i32, %c0_i32_0 : i32, i32, i32
  }
}

</mosaic_0001>

<bundles_post_ra>
// kernel: tpu_custom_call.1
= control target key start
LH: loop header
LB: loop body
LE: loop exit
PB: predicated region body
PF: predicated region fallthrough
CT: control target
= control target key end

     0   :  { %8 = vsyncpa [#allocation3], 0  ;;  %s2949_s0 = inlined_call_operand.vmem [shape: f32[2,17,17,4], index: 0, kind: input, shape index: {}]   ;;  %s2950_s1 = inlined_call_operand.vmem [shape: f32[4,4,8], index: 1, kind: input, shape index: {}]   ;;  %s2951_s2 = inlined_call_operand.vmem [shape: f32[8,1], index: 2, kind: input, shape index: {}]   ;;  %s2952_s3 = inlined_call_operand.hbm [shape: f32[2,8,256], index: 3, kind: output, shape index: {}]  }
   0x1   :  { %10 = vsyncpa [#allocation3 + $0x1], 0  ;;  %s2232_s12 = smov 0   ;;  %s2234_s13 = smov 0  }
   0x2   :  { %s2236_s14 = smov 0   ;;  %s2238_s15 = smov 0  }
   0x3 LB: > { %s2253_s16 = sadd.s32 4294967295, %s2208_s15   ;;  %s1626_s17 = sadd.s32 4294967294, %s2208_s15   ;;  %s2208_s15 = sphi %s2238_s15, %s2974_s15   ;;  %s2204_s14 = sphi %s2236_s14, %s2973_s14   ;;  %s2200_s13 = sphi %s2234_s13, %s2972_s13   ;;  %s2196_s12 = sphi %s2232_s12, %s2971_s12  }
   0x4   : > { %s2257_s18 = sadd.s32 1, %s2208_s15   ;;  %s91_s19 = sadd.s32 1, %s2204_s14 }
   0x5   : > { %s88_s20 = ssub.s32 %s2208_s15, %s2257_s18  ;;  %p101_p0 = scmp.ne.s32.totalorder %s2204_s14, %s2200_s13 }
   0x6   : > { %p89_p1 = scmp.eq.s32.totalorder %s88_s20, 0  ;;  %p102_p2 = scmp.eq.s32.totalorder %s2253_s16, 1 }
   0x7   : > { %p107_p3 = scmp.ne.s32.totalorder %s2200_s13, %s2196_s12  ;;  %p108_p4 = scmp.eq.s32.totalorder %s1626_s17, 1 }
   0x8   : > { %s2268_s21 = scalar_select %p89_p1, %s2204_s14, %s91_s19  }
   0x9   : > { %p2270_p5 = por %p102_p2, %p101_p0  ;;  %p2274_p6 = por %p108_p4, %p107_p3 }
   0xa   : > { %p1629_p7 = scmp.ge.s32.totalorder %s2208_s15, 1  ;;  %p140_p8 = scmp.lt.s32.totalorder %s2208_s15, 3 }
   0xc   : > { %p141_p9 = pnand %p1629_p7, %p140_p8 }
   0xe   : > { %144 = sbr.rel (%p141_p9) target bundleno = 466 (0x1d2), region = 32 }
  0x13   : > { %v1632_v0 = vld [vmem:[%s2950_s1 + $0x4] sm:$0xf]  ;;  %vm425_vm0 = vcmask 1043456   ;;  %v357_v1 = vld [vmem:[%s2950_s1] sm:$0xf]  ;;  %p164_p10 = scmp.lt.s32.totalorder %s2253_s16, 1 }
  0x14   : > { %1905 = vmatprep.subr.msk.mxu0 %vm425_vm0, %v1632_v0  ;;  %1955 = vmatprep.subr.msk.mxu1 %vm425_vm0, %v357_v1  ;;  %v1699_v2 = vld [vmem:[%s2950_s1 + $0x8] sm:$0xf]  ;;  %v1733_v3 = vld [vmem:[%s2950_s1 + $0xc] sm:$0xf]  ;;  %vm360_vm1 = vcmask 31744   ;;  %vm268_vm2 = vcmask 1046528  }
  0x15   : > { %1906 = vmatpush3.msk.msra.mxu0 %vm425_vm0, %v1632_v0  ;;  %s165_s5 = scalar_select %p164_p10, %s2253_s16, 1  ;;  %1956 = vmatpush3.msk.msra.mxu1 %vm425_vm0, %v357_v1 }
  0x16   : > { %2005 = vmatprep.subr.msk.mxu0 %vm425_vm0, %v1699_v2  ;;  %2055 = vmatprep.subr.msk.mxu1 %vm425_vm0, %v1733_v3  ;;  %s161_s17 = sand.u32 1, %s2200_s13   ;;  %s1772_s24 = sshll.u32 %s2253_s16, 8 }
  0x17   : > { %s2105_s6 = smul.u32 408, %s165_s5  ;;  %s1630_s19 = sshll.u32 %s161_s17, 4 }
  0x18   : > { %s163_s20 = scalar_lea.vmem [#allocation2], %s1630_s19  ;;  %s1565_s28 = scalar_lea.hbm %s2952_s3, %s1772_s24 }
  0x19   : > { %s2303_s9 = scalar_lea.vmem %s2949_s0, %s2105_s6  ;;  %s1567_s25 = sshll.u32 %s163_s20, 4  ;;  %s1568_s25 = int_to_ptr.vmem [resolvable:$true] %s1567_s25 }
  0x1a   : > { %v169_v4 = vld [vmem:[%s2303_s9] sm:$0xff]  ;;  %v170_v5 = vld [vmem:[%s2303_s9 + $0x8] sm:$0xff]  ;;  %v171_v6 = vld [vmem:[%s2303_s9 + $0x10] sm:$0x1]  ;;  %s1553_s29 = scalar_lea.sflag [#allocation3], %s161_s17  ;;  %s2148_s30 = scalar_lea.vmem %s1568_s25, 256 }
  0x1b   : > { %v269_v7 = vrot.slane %v169_v4, 1  ;;  %v270_v8 = vrot.slane %v170_v5, 1  ;;  %1957 = vmatprep.mubr.msk.f32.mxu1 %vm360_vm1, %v169_v4  ;;  %v272_v9 = vrot.slane %v171_v6, 1  ;;  %v2310_v10 = vld [vmem:[%s2303_s9 + $0x18] sm:$0xff]  ;;  %v2313_v11 = vld [vmem:[%s2303_s9 + $0x20] sm:$0xff]  ;;  %v2316_v12 = vld [vmem:[%s2303_s9 + $0x30] sm:$0xff]  ;;  %p2149_p11 = scmp.ne.s32.totalorder %s1568_s25, %s2148_s30 }
  0x1c   : > { %1958 = vmatmul.mubr.msk.f32.vlgmr.msra.gmra.mxu1 %vm360_vm1, %v170_v5  ;;  %v274_v13 = vrot.slane %v2310_v10, 1  ;;  %v275_v14 = vrot.slane %v2313_v11, 1  ;;  %v174_v15 = vld [vmem:[%s2303_s9 + $0x28] sm:$0x1]  ;;  %v2323_v16 = vld [vmem:[%s2303_s9 + $0x38] sm:$0xff]  ;;  %v279_v17 = vrot.slane %v2316_v12, 1 }
  0x1d   : > { %v271_v18 = vsel %vm268_vm2, %v269_v7, %v270_v8  ;;  %v273_v19 = vsel %vm268_vm2, %v270_v8, %v272_v9  ;;  %2056 = vmatpush3.msk.msra.mxu1 %vm425_vm0, %v1733_v3  ;;  %1960 = vmatprep.mubr.msk.f32.mxu1 %vm360_vm1, %v2310_v10  ;;  %v277_v20 = vrot.slane %v174_v15, 1  ;;  %v280_v21 = vrot.slane %v2323_v16, 1  ;;  %v177_v22 = vld [vmem:[%s2303_s9 + $0x40] sm:$0x1]  ;;  %v2338_v24 = vld [vmem:[%s2303_s9 + $0x48] sm:$0xff]  ;;  %v2341_v25 = vld [vmem:[%s2303_s9 + $0x50] sm:$0xff]  ;;  %p2150_p12 = pnand %p2149_p11, %p2270_p5 }
  0x1e   : > { %1907 = vmatprep.mubr.msk.f32.mxu0 %vm360_vm1, %v271_v18  ;;  %v2335_v23 = vsel %vm268_vm2, %v274_v13, %v275_v14  ;;  %v282_v27 = vrot.slane %v177_v22, 1  ;;  %v284_v29 = vrot.slane %v2338_v24, 1  ;;  %v285_v30 = vrot.slane %v2341_v25, 1  ;;  %v180_v31 = vld [vmem:[%s2303_s9 + $0x58] sm:$0x1]  ;;  %v2361_v32 = vld [vmem:[%s2303_s9 + $0x60] sm:$0xff] }
  0x1f   : > { %1908 = vmatmul.mubr.msk.f32.vlgmr.msra.gmra.mxu0 %vm360_vm1, %v273_v19  ;;  %v2348_v26 = vsel %vm268_vm2, %v275_v14, %v277_v20  ;;  %v2353_v28 = vsel %vm268_vm2, %v279_v17, %v280_v21  ;;  %v2364_v33 = vld [vmem:[%s2303_s9 + $0x68] sm:$0xff]  ;;  %v287_v35 = vrot.slane %v180_v31, 1  ;;  %v289_v37 = vrot.slane %v2361_v32, 1  ;;  %v183_v39 = vld [vmem:[%s2303_s9 + $0x70] sm:$0x1]  ;;  %v2384_v40 = vld [vmem:[%s2303_s9 + $0x78] sm:$0xff]  ;;  %p2151_p13 = pneg %p2150_p12 }
  0x20   : > { %2006 = vmatpush3.msk.msra.mxu0 %vm425_vm0, %v1699_v2  ;;  %1910 = vmatprep.mubr.msk.f32.mxu0 %vm360_vm1, %v2335_v23  ;;  %v2371_v34 = vsel %vm268_vm2, %v280_v21, %v282_v27  ;;  %v2376_v36 = vsel %vm268_vm2, %v284_v29, %v285_v30  ;;  %v290_v38 = vrot.slane %v2364_v33, 1  ;;  %v2387_v41 = vld [vmem:[%s2303_s9 + $0x80] sm:$0xff]  ;;  %v292_v43 = vrot.slane %v183_v39, 1  ;;  %v186_v47 = vld [vmem:[%s2303_s9 + $0x88] sm:$0x1]  ;;  %v2407_v48 = vld [vmem:[%s2303_s9 + $0x90] sm:$0xff] }
  0x21   : > { %1961 = vmatmul.mubr.msk.f32.gmra.mxu1 %vm360_vm1, %v2313_v11  ;;  %v2394_v42 = vsel %vm268_vm2, %v285_v30, %v287_v35  ;;  %v294_v45 = vrot.slane %v2384_v40, 1  ;;  %v295_v46 = vrot.slane %v2387_v41, 1  ;;  %v2410_v49 = vld [vmem:[%s2303_s9 + $0x98] sm:$0xff]  ;;  %v297_v51 = vrot.slane %v186_v47, 1  ;;  %v2420_v52 = vld [vmem:[%s2303_s9 + $0x180] sm:$0xff]  ;;  %v2423_v53 = vld [vmem:[%s2303_s9 + $0x188] sm:$0xff] }
  0x22   : > { %1963 = vmatprep.mubr.msk.f32.mxu1 %vm360_vm1, %v2316_v12  ;;  %v2399_v44 = vsel %vm268_vm2, %v289_v37, %v290_v38  ;;  %v2417_v50 = vsel %vm268_vm2, %v290_v38, %v292_v43  ;;  %2959 = vst [vmem:[#allocation5_spill] sm:$0xff] %v2420_v52  ;;  %2960 = vst [vmem:[#allocation6_spill] sm:$0xff] %v2423_v53  ;;  %v219_v54 = vld [vmem:[%s2303_s9 + $0x190] sm:$0x1]  ;;  %v299_v56 = vrot.slane %v2407_v48, 1  ;;  %v300_v57 = vrot.slane %v2410_v49, 1 }
  0x23   : > { %1911 = vmatmul.mubr.msk.f32.gmra.mxu0 %vm360_vm1, %v2348_v26  ;;  %v2429_v55 = vsel %vm268_vm2, %v294_v45, %v295_v46  ;;  %v189_v58 = vld [vmem:[%s2303_s9 + $0xa0] sm:$0x1]  ;;  %v2435_v59 = vld [vmem:[%s2303_s9 + $0xa8] sm:$0xff]  ;;  %v2440_v60 = vld [vmem:[%s2303_s9 + $0xb0] sm:$0xff]  ;;  %v352_v61 = vrot.slane %v2420_v52, 1  ;;  %v353_v62 = vrot.slane %v2423_v53, 1  ;;  %v2449_v0 = vsel %vm268_vm2, %v295_v46, %v297_v51 }
  0x24   : > { %1913 = vmatprep.mubr.msk.f32.mxu0 %vm360_vm1, %v2353_v28  ;;  %v355_v63 = vrot.slane %v219_v54, 1  ;;  %v302_v1 = vrot.slane %v189_v58, 1  ;;  %v304_v2 = vrot.slane %v2435_v59, 1  ;;  %v2455_v3 = vsel %vm268_vm2, %v299_v56, %v300_v57  ;;  %v192_v5 = vld [vmem:[%s2303_s9 + $0xb8] sm:$0x1]  ;;  %v2468_v8 = vld [vmem:[%s2303_s9 + $0xc0] sm:$0xff] }
  0x25   : > { %1964 = vmatmul.mubr.msk.f32.gmra.mxu1 %vm360_vm1, %v2323_v16  ;;  %v305_v4 = vrot.slane %v2440_v60, 1  ;;  %v2460_v6 = vsel %vm268_vm2, %v352_v61, %v353_v62  ;;  %v2471_v9 = vld [vmem:[%s2303_s9 + $0xc8] sm:$0xff]  ;;  %v307_v14 = vrot.slane %v192_v5, 1  ;;  %v309_v17 = vrot.slane %v2468_v8, 1  ;;  %v195_v19 = vld [vmem:[%s2303_s9 + $0xd0] sm:$0x1] }
  0x26   : > { %1966 = vmatprep.mubr.msk.f32.mxu1 %vm360_vm1, %v2338_v24  ;;  %2961 = vst [vmem:[#allocation7_spill] sm:$0xff] %v2460_v6  ;;  %v2463_v7 = vsel %vm268_vm2, %v353_v62, %v355_v63  ;;  %v2478_v13 = vsel %vm268_vm2, %v300_v57, %v302_v1  ;;  %v310_v18 = vrot.slane %v2471_v9, 1  ;;  %v2491_v20 = vld [vmem:[%s2303_s9 + $0xd8] sm:$0xff]  ;;  %v2494_v21 = vld [vmem:[%s2303_s9 + $0xe0] sm:$0xff]  ;;  %v312_v27 = vrot.slane %v195_v19, 1  ;;  %v2514_v37 = vld [vmem:[%s2303_s9 + $0xf0] sm:$0xff] }
  0x27   : > { %1914 = vmatmul.mubr.msk.f32.gmra.mxu0 %vm360_vm1, %v2371_v34  ;;  %2962 = vst [vmem:[#allocation8_spill] sm:$0xff] %v2463_v7  ;;  %v2483_v15 = vsel %vm268_vm2, %v304_v2, %v305_v4  ;;  %v2501_v22 = vsel %vm268_vm2, %v305_v4, %v307_v14  ;;  %v314_v30 = vrot.slane %v2491_v20, 1  ;;  %v315_v31 = vrot.slane %v2494_v21, 1  ;;  %v198_v35 = vld [vmem:[%s2303_s9 + $0xe8] sm:$0x1]  ;;  %v2517_v38 = vld [vmem:[%s2303_s9 + $0xf8] sm:$0xff] }
  0x28   : > { %1916 = vmatprep.mubr.msk.f32.mxu0 %vm360_vm1, %v2376_v36  ;;  %v2506_v29 = vsel %vm268_vm2, %v309_v17, %v310_v18  ;;  %v2524_v39 = vsel %vm268_vm2, %v310_v18, %v312_v27  ;;  %v317_v43 = vrot.slane %v198_v35, 1  ;;  %v319_v46 = vrot.slane %v2514_v37, 1  ;;  %v201_v51 = vld [vmem:[%s2303_s9 + $0x100] sm:$0x1]  ;;  %v2537_v54 = vld [vmem:[%s2303_s9 + $0x108] sm:$0xff]  ;;  %v2540_v56 = vld [vmem:[%s2303_s9 + $0x110] sm:$0xff] }
  0x29   : > { %1967 = vmatmul.mubr.msk.f32.gmra.mxu1 %vm360_vm1, %v2341_v25  ;;  %v2529_v45 = vsel %vm268_vm2, %v314_v30, %v315_v31  ;;  %v320_v47 = vrot.slane %v2517_v38, 1  ;;  %v322_v58 = vrot.slane %v201_v51, 1  ;;  %v324_v62 = vrot.slane %v2537_v54, 1  ;;  %v204_v1 = vld [vmem:[%s2303_s9 + $0x118] sm:$0x1]  ;;  %v2560_v2 = vld [vmem:[%s2303_s9 + $0x120] sm:$0xff] }
  0x2a   : > { %1969 = vmatprep.mubr.msk.f32.mxu1 %vm360_vm1, %v2361_v32  ;;  %v2547_v57 = vsel %vm268_vm2, %v315_v31, %v317_v43  ;;  %v325_v63 = vrot.slane %v2540_v56, 1  ;;  %v2563_v4 = vld [vmem:[%s2303_s9 + $0x128] sm:$0xff]  ;;  %v327_v14 = vrot.slane %v204_v1, 1  ;;  %v329_v18 = vrot.slane %v2560_v2, 1  ;;  %v207_v27 = vld [vmem:[%s2303_s9 + $0x130] sm:$0x1] }
  0x2b   : > { %1917 = vmatmul.mubr.msk.f32.gmra.mxu0 %vm360_vm1, %v2394_v42  ;;  %v2552_v61 = vsel %vm268_vm2, %v319_v46, %v320_v47  ;;  %2963 = vst [vmem:[#allocation9_spill] sm:$0xff] %v2563_v4  ;;  %v2570_v5 = vsel %vm268_vm2, %v320_v47, %v322_v58  ;;  %v330_v19 = vrot.slane %v2563_v4, 1  ;;  %v2583_v30 = vld [vmem:[%s2303_s9 + $0x138] sm:$0xff]  ;;  %v2586_v31 = vld [vmem:[%s2303_s9 + $0x140] sm:$0xff]  ;;  %v332_v43 = vrot.slane %v207_v27, 1  ;;  %v2629_v52 = vld [vmem:[%s2303_s9 + $0x168] sm:$0xff] }
  0x2c   : > { %1919 = vmatprep.mubr.msk.f32.mxu0 %vm360_vm1, %v2399_v44  ;;  %v2575_v17 = vsel %vm268_vm2, %v324_v62, %v325_v63  ;;  %2964 = vst [vmem:[#allocation10_spill] sm:$0xff] %v2583_v30  ;;  %v2593_v35 = vsel %vm268_vm2, %v325_v63, %v327_v14  ;;  %v334_v47 = vrot.slane %v2583_v30, 1  ;;  %v335_v51 = vrot.slane %v2586_v31, 1  ;;  %v210_v58 = vld [vmem:[%s2303_s9 + $0x148] sm:$0x1]  ;;  %v2606_v62 = vld [vmem:[%s2303_s9 + $0x150] sm:$0xff] }
  0x2d   : > { %1970 = vmatmul.mubr.msk.f32.gmra.mxu1 %vm360_vm1, %v2364_v33  ;;  %v2598_v46 = vsel %vm268_vm2, %v329_v18, %v330_v19  ;;  %v2609_v63 = vld [vmem:[%s2303_s9 + $0x158] sm:$0xff]  ;;  %v2616_v1 = vsel %vm268_vm2, %v330_v19, %v332_v43  ;;  %v337_v14 = vrot.slane %v210_v58, 1  ;;  %v339_v27 = vrot.slane %v2606_v62, 1  ;;  %v213_v7 = vld [vmem:[%s2303_s9 + $0x160] sm:$0x1]  ;;  %v2632_v19 = vld [vmem:[%s2303_s9 + $0x170] sm:$0xff] }
  0x2e   : > { %1972 = vmatprep.mubr.msk.f32.mxu1 %vm360_vm1, %v2384_v40  ;;  %v2621_v18 = vsel %vm268_vm2, %v334_v47, %v335_v51  ;;  %v340_v53 = vrot.slane %v2609_v63, 1  ;;  %v342_v47 = vrot.slane %v213_v7, 1  ;;  %v344_v6 = vrot.slane %v2629_v52, 1  ;;  %s2211_s4 = smov [#allocation2]  }
  0x2f   : > { %1920 = vmatmul.mubr.msk.f32.gmra.mxu0 %vm360_vm1, %v2417_v50  ;;  %v2639_v43 = vsel %vm268_vm2, %v335_v51, %v337_v14  ;;  %s2152_s5 = sshll.u32 %s2211_s4, 4  ;;  %s2153_s5 = int_to_ptr.vmem [resolvable:$false] %s2152_s5 }
  0x30   : > { %1922 = vmatprep.mubr.msk.f32.mxu0 %vm360_vm1, %v2429_v55  ;;  %v2644_v58 = vsel %vm268_vm2, %v339_v27, %v340_v53  ;;  %v2656_v7 = vsel %vm268_vm2, %v340_v53, %v342_v47  ;;  %s2154_s6 = scalar_lea.vmem %s2153_s5, 512  ;;  %p2155_p0 = scmp.lt.s32.totalorder %s1568_s25, %s2153_s5 }
  0x31   : > { %1973 = vmatmul.mubr.msk.f32.gmra.mxu1 %vm360_vm1, %v2387_v41  ;;  %p2156_p1 = scmp.lt.s32.totalorder %s2154_s6, %s2148_s30 }
  0x32   : > { %1975 = vmatprep.mubr.msk.f32.mxu1 %vm360_vm1, %v2407_v48 }
  0x33   : > { %1923 = vmatmul.mubr.msk.f32.gmra.mxu0 %vm360_vm1, %v2449_v0  ;;  %p2157_p2 = por %p2156_p1, %p2155_p0 }
  0x34   : > { %1925 = vmatprep.mubr.msk.f32.mxu0 %vm360_vm1, %v2455_v3 }
  0x35   : > { %1976 = vmatmul.mubr.msk.f32.gmra.mxu1 %vm360_vm1, %v2410_v49  ;;  %p2158_p3 = pnand %p2157_p2, %p2151_p13 }
  0x36   : > { %1978 = vmatprep.mubr.msk.f32.mxu1 %vm360_vm1, %v2435_v59 }
  0x37   : > { %1926 = vmatmul.mubr.msk.f32.gmra.mxu0 %vm360_vm1, %v2478_v13 }
  0x38   : > { %1928 = vmatprep.mubr.msk.f32.mxu0 %vm360_vm1, %v2483_v15 }
  0x39   : > { %1979 = vmatmul.mubr.msk.f32.gmra.mxu1 %vm360_vm1, %v2440_v60 }
  0x3a   : > { %1981 = vmatprep.mubr.msk.f32.mxu1 %vm360_vm1, %v2468_v8 }
  0x3b   : > { %1929 = vmatmul.mubr.msk.f32.gmra.mxu0 %vm360_vm1, %v2501_v22 }
  0x3c   : > { %1931 = vmatprep.mubr.msk.f32.mxu0 %vm360_vm1, %v2506_v29 }
  0x3d   : > { %1982 = vmatmul.mubr.msk.f32.gmra.mxu1 %vm360_vm1, %v2471_v9 }
  0x3e   : > { %1984 = vmatprep.mubr.msk.f32.mxu1 %vm360_vm1, %v2491_v20 }
  0x3f   : > { %1932 = vmatmul.mubr.msk.f32.gmra.mxu0 %vm360_vm1, %v2524_v39 }
  0x40   : > { %1934 = vmatprep.mubr.msk.f32.mxu0 %vm360_vm1, %v2529_v45 }
  0x41   : > { %1985 = vmatmul.mubr.msk.f32.gmra.mxu1 %vm360_vm1, %v2494_v21 }
  0x42   : > { %1987 = vmatprep.mubr.msk.f32.mxu1 %vm360_vm1, %v2514_v37 }
  0x43   : > { %1935 = vmatmul.mubr.msk.f32.gmra.mxu0 %vm360_vm1, %v2547_v57 }
  0x44   : > { %1937 = vmatprep.mubr.msk.f32.mxu0 %vm360_vm1, %v2552_v61 }
  0x45   : > { %1988 = vmatmul.mubr.msk.f32.gmra.mxu1 %vm360_vm1, %v2517_v38 }
  0x46   : > { %1990 = vmatprep.mubr.msk.f32.mxu1 %vm360_vm1, %v2537_v54 }
  0x47   : > { %1938 = vmatmul.mubr.msk.f32.gmra.mxu0 %vm360_vm1, %v2570_v5 }
  0x48   : > { %1940 = vmatprep.mubr.msk.f32.mxu0 %vm360_vm1, %v2575_v17 }
  0x49   : > { %1991 = vmatmul.mubr.msk.f32.gmra.mxu1 %vm360_vm1, %v2540_v56 }
  0x4a   : > { %1993 = vmatprep.mubr.msk.f32.mxu1 %vm360_vm1, %v2560_v2 }
  0x4b   : > { %1941 = vmatmul.mubr.msk.f32.gmra.mxu0 %vm360_vm1, %v2593_v35 }
  0x4c   : > { %1943 = vmatprep.mubr.msk.f32.mxu0 %vm360_vm1, %v2598_v46 }
  0x4d   : > { %1994 = vmatmul.mubr.msk.f32.gmra.mxu1 %vm360_vm1, %v2563_v4  ;;  %v216_v4 = vld [vmem:[%s2303_s9 + $0x178] sm:$0x1] }
  0x4e   : > { %1996 = vmatprep.mubr.msk.f32.mxu1 %vm360_vm1, %v2583_v30  ;;  %v345_v30 = vrot.slane %v2632_v19, 1  ;;  %v347_v51 = vrot.slane %v216_v4, 1 }
  0x4f   : > { %1944 = vmatmul.mubr.msk.f32.gmra.mxu0 %vm360_vm1, %v2616_v1 }
  0x50   : > { %1946 = vmatprep.mubr.msk.f32.mxu0 %vm360_vm1, %v2621_v18  ;;  %v346_v14 = vsel %vm268_vm2, %v344_v6, %v345_v30  ;;  %v348_v27 = vsel %vm268_vm2, %v345_v30, %v347_v51 }
  0x51   : > { %1997 = vmatmul.mubr.msk.f32.gmra.mxu1 %vm360_vm1, %v2586_v31 }
  0x52   : > { %1999 = vmatprep.mubr.msk.f32.mxu1 %vm360_vm1, %v2606_v62 }
  0x53   : > { %1947 = vmatmul.mubr.msk.f32.gmra.mxu0 %vm360_vm1, %v2639_v43 }
  0x54   : > { %1949 = vmatprep.mubr.msk.f32.mxu0 %vm360_vm1, %v2644_v58 }
  0x55   : > { %2000 = vmatmul.mubr.msk.f32.gmra.mxu1 %vm360_vm1, %v2609_v63 }
  0x56   : > { %2002 = vmatprep.mubr.msk.f32.mxu1 %vm360_vm1, %v2629_v52 }
  0x57   : > { %1950 = vmatmul.mubr.msk.f32.gmra.mxu0 %vm360_vm1, %v2656_v7 }
  0x58   : > { %1952 = vmatprep.mubr.msk.f32.mxu0 %vm360_vm1, %v346_v14 }
  0x59   : > { %2003 = vmatmul.mubr.msk.f32.gmra.mxu1 %vm360_vm1, %v2632_v19 }
  0x5a   : > { %2057 = vmatprep.mubr.msk.f32.mxu1 %vm360_vm1, %v2335_v23  ;;  %v2969_v23 = vld [vmem:[#allocation8_spill] sm:$0xff] }
  0x5b   : > { %1953 = vmatmul.mubr.msk.f32.gmra.mxu0 %vm360_vm1, %v348_v27 }
  0x5c   : > { %2007 = vmatprep.mubr.msk.f32.mxu0 %vm360_vm1, %v2310_v10  ;;  %v2965_v10 = vld [vmem:[#allocation9_spill] sm:$0xff] }
  0x5d   : > { %2058 = vmatmul.mubr.msk.f32.vlgmr.msra.gmra.mxu1 %vm360_vm1, %v2348_v26  ;;  %v1542_v26 = vld [vmem:[%s2951_s2] sm:$0xff] }
  0x5e   : > { %2060 = vmatprep.mubr.msk.f32.mxu1 %vm360_vm1, %v2353_v28 }
  0x5f   : > { %2008 = vmatmul.mubr.msk.f32.vlgmr.msra.gmra.mxu0 %vm360_vm1, %v2313_v11  ;;  %v2966_v11 = vld [vmem:[#allocation10_spill] sm:$0xff] }
  0x60   : > { %2010 = vmatprep.mubr.msk.f32.mxu0 %vm360_vm1, %v2316_v12  ;;  %v2967_v12 = vld [vmem:[#allocation7_spill] sm:$0xff] }
  0x61   : > { %2061 = vmatmul.mubr.msk.f32.gmra.mxu1 %vm360_vm1, %v2371_v34 }
  0x62   : > { %2063 = vmatprep.mubr.msk.f32.mxu1 %vm360_vm1, %v2376_v36 }
  0x63   : > { %2011 = vmatmul.mubr.msk.f32.gmra.mxu0 %vm360_vm1, %v2323_v16  ;;  %v2968_v16 = vld [vmem:[#allocation5_spill] sm:$0xff] }
  0x64   : > { %2013 = vmatprep.mubr.msk.f32.mxu0 %vm360_vm1, %v2338_v24  ;;  %v2970_v24 = vld [vmem:[#allocation6_spill] sm:$0xff] }
  0x65   : > { %2064 = vmatmul.mubr.msk.f32.gmra.mxu1 %vm360_vm1, %v2394_v42 }
  0x66   : > { %2066 = vmatprep.mubr.msk.f32.mxu1 %vm360_vm1, %v2399_v44 }
  0x67   : > { %2014 = vmatmul.mubr.msk.f32.gmra.mxu0 %vm360_vm1, %v2341_v25  ;;  %v2210_v25 = vmov 0  }
  0x68   : > { %2016 = vmatprep.mubr.msk.f32.mxu0 %vm360_vm1, %v2361_v32  ;;  %2146 = vset.pattern.permute.xlu1 %v2210_v25 }
  0x69   : > { %2067 = vmatmul.mubr.msk.f32.gmra.mxu1 %vm360_vm1, %v2417_v50  ;;  %1545 = vperm.xlu1 %2146, %v1542_v26  }
  0x6a   : > { %2069 = vmatprep.mubr.msk.f32.mxu1 %vm360_vm1, %v2429_v55 }
  0x6b   : > { %2017 = vmatmul.mubr.msk.f32.gmra.mxu0 %vm360_vm1, %v2364_v33 }
  0x6c   : > { %2019 = vmatprep.mubr.msk.f32.mxu0 %vm360_vm1, %v2384_v40 }
  0x6d   : > { %2070 = vmatmul.mubr.msk.f32.gmra.mxu1 %vm360_vm1, %v2449_v0 }
  0x6e   : > { %2072 = vmatprep.mubr.msk.f32.mxu1 %vm360_vm1, %v2455_v3 }
  0x6f   : > { %2020 = vmatmul.mubr.msk.f32.gmra.mxu0 %vm360_vm1, %v2387_v41 }
  0x70   : > { %2022 = vmatprep.mubr.msk.f32.mxu0 %vm360_vm1, %v2407_v48 }
  0x71   : > { %2073 = vmatmul.mubr.msk.f32.gmra.mxu1 %vm360_vm1, %v2478_v13 }
  0x72   : > { %2075 = vmatprep.mubr.msk.f32.mxu1 %vm360_vm1, %v2483_v15 }
  0x73   : > { %2023 = vmatmul.mubr.msk.f32.gmra.mxu0 %vm360_vm1, %v2410_v49 }
  0x74   : > { %2025 = vmatprep.mubr.msk.f32.mxu0 %vm360_vm1, %v2435_v59 }
  0x75   : > { %2076 = vmatmul.mubr.msk.f32.gmra.mxu1 %vm360_vm1, %v2501_v22 }
  0x76   : > { %2078 = vmatprep.mubr.msk.f32.mxu1 %vm360_vm1, %v2506_v29 }
  0x77   : > { %2026 = vmatmul.mubr.msk.f32.gmra.mxu0 %vm360_vm1, %v2440_v60 }
  0x78   : > { %2028 = vmatprep.mubr.msk.f32.mxu0 %vm360_vm1, %v2468_v8 }
  0x79   : > { %2079 = vmatmul.mubr.msk.f32.gmra.mxu1 %vm360_vm1, %v2524_v39 }
  0x7a   : > { %2081 = vmatprep.mubr.msk.f32.mxu1 %vm360_vm1, %v2529_v45 }
  0x7b   : > { %2029 = vmatmul.mubr.msk.f32.gmra.mxu0 %vm360_vm1, %v2471_v9 }
  0x7c   : > { %2031 = vmatprep.mubr.msk.f32.mxu0 %vm360_vm1, %v2491_v20 }
  0x7d   : > { %2082 = vmatmul.mubr.msk.f32.gmra.mxu1 %vm360_vm1, %v2547_v57 }
  0x7e   : > { %2084 = vmatprep.mubr.msk.f32.mxu1 %vm360_vm1, %v2552_v61 }
  0x7f   : > { %2032 = vmatmul.mubr.msk.f32.gmra.mxu0 %vm360_vm1, %v2494_v21 }
  0x80   : > { %2034 = vmatprep.mubr.msk.f32.mxu0 %vm360_vm1, %v2514_v37 }
  0x81   : > { %2085 = vmatmul.mubr.msk.f32.gmra.mxu1 %vm360_vm1, %v2570_v5 }
  0x82   : > { %2087 = vmatprep.mubr.msk.f32.mxu1 %vm360_vm1, %v2575_v17 }
  0x83   : > { %2035 = vmatmul.mubr.msk.f32.gmra.mxu0 %vm360_vm1, %v2517_v38 }
  0x84   : > { %2037 = vmatprep.mubr.msk.f32.mxu0 %vm360_vm1, %v2537_v54 }
  0x85   : > { %2088 = vmatmul.mubr.msk.f32.gmra.mxu1 %vm360_vm1, %v2593_v35 }
  0x86   : > { %2090 = vmatprep.mubr.msk.f32.mxu1 %vm360_vm1, %v2598_v46 }
  0x87   : > { %2038 = vmatmul.mubr.msk.f32.gmra.mxu0 %vm360_vm1, %v2540_v56 }
  0x88   : > { %2040 = vmatprep.mubr.msk.f32.mxu0 %vm360_vm1, %v2560_v2 }
  0x89   : > { %2091 = vmatmul.mubr.msk.f32.gmra.mxu1 %vm360_vm1, %v2616_v1 }
  0x8a   : > { %2093 = vmatprep.mubr.msk.f32.mxu1 %vm360_vm1, %v2621_v18 }
  0x8b   : > { %2041 = vmatmul.mubr.msk.f32.gmra.mxu0 %vm360_vm1, %v2965_v10 }
  0x8c   : > { %2043 = vmatprep.mubr.msk.f32.mxu0 %vm360_vm1, %v2966_v11 }
  0x8d   : > { %2094 = vmatmul.mubr.msk.f32.gmra.mxu1 %vm360_vm1, %v2639_v43 }
  0x8e   : > { %2096 = vmatprep.mubr.msk.f32.mxu1 %vm360_vm1, %v2644_v58 }
  0x8f   : > { %2044 = vmatmul.mubr.msk.f32.gmra.mxu0 %vm360_vm1, %v2586_v31 }
  0x90   : > { %2046 = vmatprep.mubr.msk.f32.mxu0 %vm360_vm1, %v2606_v62 }
  0x91   : > { %2097 = vmatmul.mubr.msk.f32.gmra.mxu1 %vm360_vm1, %v2656_v7 }
  0x92   : > { %2099 = vmatprep.mubr.msk.f32.mxu1 %vm360_vm1, %v346_v14 }
  0x93   : > { %2047 = vmatmul.mubr.msk.f32.gmra.mxu0 %vm360_vm1, %v2609_v63 }
  0x94   : > { %2049 = vmatprep.mubr.msk.f32.mxu0 %vm360_vm1, %v2629_v52 }
  0x95   : > { %2100 = vmatmul.mubr.msk.f32.gmra.mxu1 %vm360_vm1, %v348_v27 }
  0x96   : > { %2102 = vmatprep.mubr.msk.f32.mxu1 %vm360_vm1, %v2967_v12 }
  0x97   : > { %2050 = vmatmul.mubr.msk.f32.gmra.mxu0 %vm360_vm1, %v2632_v19 }
  0x98   : > { %2052 = vmatprep.mubr.msk.f32.mxu0 %vm360_vm1, %v2968_v16 }
  0x99   : > { %2103 = vmatmul.mubr.msk.f32.gmra.mxu1 %vm360_vm1, %v2969_v23 }
  0x9b   : > { %2053 = vmatmul.mubr.msk.f32.gmra.mxu0 %vm360_vm1, %v2970_v24 }
  0xdc   : > { %v1959_v28 = vpop.f32.mrf.mxu1 }
  0xde   : > { %v2800_v32 = vpop.f32.mrf.mxu1 }
  0xdf   : > { %v1909_v33 = vpop.f32.mrf.mxu0 }
  0xe0   : > { %v2802_v34 = vadd.f32 %v1959_v28, %v1909_v33 }
  0xe1   : > { %v2804_v36 = vpop.f32.mrf.mxu0  ;;  %v1962_v40 = vpop.f32.mrf.mxu1 }
  0xe3   : > { %v1912_v41 = vpop.f32.mrf.mxu0  ;;  %v797_v42 = vpop.f32.mrf.mxu1 }
  0xe4   : > { %v2806_v44 = vadd.f32 %v1962_v40, %v1912_v41 }
  0xe5   : > { %v505_v48 = vpop.f32.mrf.mxu0  ;;  %v1965_v49 = vpop.f32.mrf.mxu1 }
  0xe6   : > { %v2808_v50 = vadd.f32 %v797_v42, %v505_v48 }
  0xe7   : > { %v1915_v52 = vpop.f32.mrf.mxu0  ;;  %v807_v53 = vpop.f32.mrf.mxu1 }
  0xe8   : > { %v2810_v55 = vadd.f32 %v1965_v49, %v1915_v52 }
  0xe9   : > { %v515_v59 = vpop.f32.mrf.mxu0  ;;  %v1968_v60 = vpop.f32.mrf.mxu1 }
  0xea   : > { %v2812_v0 = vadd.f32 %v807_v53, %v515_v59 }
  0xeb   : > { %v1918_v3 = vpop.f32.mrf.mxu0  ;;  %v817_v6 = vpop.f32.mrf.mxu1 }
  0xec   : > { %v2814_v8 = vadd.f32 %v1968_v60, %v1918_v3 }
  0xed   : > { %v525_v9 = vpop.f32.mrf.mxu0  ;;  %v1971_v13 = vpop.f32.mrf.mxu1 }
  0xee   : > { %v2816_v15 = vadd.f32 %v817_v6, %v525_v9 }
  0xef   : > { %v1921_v20 = vpop.f32.mrf.mxu0  ;;  %v827_v21 = vpop.f32.mrf.mxu1 }
  0xf0   : > { %v2818_v22 = vadd.f32 %v1971_v13, %v1921_v20 }
  0xf1   : > { %v535_v29 = vpop.f32.mrf.mxu0  ;;  %v1974_v37 = vpop.f32.mrf.mxu1 }
  0xf2   : > { %v2820_v38 = vadd.f32 %v827_v21, %v535_v29 }
  0xf3   : > { %v1924_v39 = vpop.f32.mrf.mxu0  ;;  %v837_v45 = vpop.f32.mrf.mxu1 }
  0xf4   : > { %v2822_v54 = vadd.f32 %v1974_v37, %v1924_v39 }
  0xf5   : > { %v545_v56 = vpop.f32.mrf.mxu0  ;;  %v1977_v57 = vpop.f32.mrf.mxu1 }
  0xf6   : > { %v2824_v61 = vadd.f32 %v837_v45, %v545_v56 }
  0xf7   : > { %v1927_v2 = vpop.f32.mrf.mxu0  ;;  %v847_v4 = vpop.f32.mrf.mxu1 }
  0xf8   : > { %v2826_v5 = vadd.f32 %v1977_v57, %v1927_v2 }
  0xf9   : > { %v555_v17 = vpop.f32.mrf.mxu0  ;;  %v1980_v30 = vpop.f32.mrf.mxu1 }
  0xfa   : > { %v2828_v31 = vadd.f32 %v847_v4, %v555_v17 }
  0xfb   : > { %v1930_v35 = vpop.f32.mrf.mxu0  ;;  %v857_v46 = vpop.f32.mrf.mxu1 }
  0xfc   : > { %v2830_v62 = vadd.f32 %v1980_v30, %v1930_v35 }
  0xfd   : > { %v565_v63 = vpop.f32.mrf.mxu0  ;;  %v1983_v1 = vpop.f32.mrf.mxu1 }
  0xfe   : > { %v2832_v18 = vadd.f32 %v857_v46, %v565_v63 }
  0xff   : > { %v1933_v19 = vpop.f32.mrf.mxu0  ;;  %v2834_v43 = vpop.f32.mrf.mxu1 }
 0x100   : > { %v2836_v47 = vadd.f32 %v1983_v1, %v1933_v19 }
 0x101   : > { %v2838_v58 = vpop.f32.mrf.mxu0  ;;  %v1986_v7 = vpop.f32.mrf.mxu1 }
 0x103   : > { %v1936_v51 = vpop.f32.mrf.mxu0  ;;  %v877_v14 = vpop.f32.mrf.mxu1 }
 0x104   : > { %v2840_v27 = vadd.f32 %v1986_v7, %v1936_v51 }
 0x105   : > { %v585_v10 = vpop.f32.mrf.mxu0  ;;  %v1989_v11 = vpop.f32.mrf.mxu1 }
 0x106   : > { %v2842_v12 = vadd.f32 %v877_v14, %v585_v10  ;;  %v788_v14 = vadd.f32 %v2800_v32, %v2804_v36 }
 0x107   : > { %v1939_v16 = vpop.f32.mrf.mxu0  ;;  %v887_v23 = vpop.f32.mrf.mxu1 }
 0x108   : > { %v2844_v24 = vadd.f32 %v1989_v11, %v1939_v16 }
 0x109   : > { %v595_v26 = vpop.f32.mrf.mxu0  ;;  %v1992_v28 = vpop.f32.mrf.mxu1 }
 0x10a   : > { %v2846_v33 = vadd.f32 %v887_v23, %v595_v26 }
 0x10b   : > { %v1942_v40 = vpop.f32.mrf.mxu0  ;;  %v897_v41 = vpop.f32.mrf.mxu1 }
 0x10c   : > { %v2848_v42 = vadd.f32 %v1992_v28, %v1942_v40 }
 0x10d   : > { %v605_v48 = vpop.f32.mrf.mxu0  ;;  %v1995_v49 = vpop.f32.mrf.mxu1 }
 0x10e   : > { %v2850_v52 = vadd.f32 %v897_v41, %v605_v48 }
 0x10f   : > { %v1945_v53 = vpop.f32.mrf.mxu0  ;;  %v907_v59 = vpop.f32.mrf.mxu1 }
 0x110   : > { %v2852_v60 = vadd.f32 %v1995_v49, %v1945_v53 }
 0x111   : > { %v615_v3 = vpop.f32.mrf.mxu0  ;;  %v1998_v6 = vpop.f32.mrf.mxu1 }
 0x112   : > { %v2854_v9 = vadd.f32 %v907_v59, %v615_v3 }
 0x113   : > { %v1948_v13 = vpop.f32.mrf.mxu0  ;;  %v917_v20 = vpop.f32.mrf.mxu1 }
 0x114   : > { %v2856_v21 = vadd.f32 %v1998_v6, %v1948_v13 }
 0x115   : > { %v625_v29 = vpop.f32.mrf.mxu0  ;;  %v2001_v37 = vpop.f32.mrf.mxu1 }
 0x116   : > { %v2858_v39 = vadd.f32 %v917_v20, %v625_v29 }
 0x117   : > { %v1951_v45 = vpop.f32.mrf.mxu0  ;;  %v927_v56 = vpop.f32.mrf.mxu1 }
 0x118   : > { %v2860_v57 = vadd.f32 %v2001_v37, %v1951_v45 }
 0x119   : > { %v635_v2 = vpop.f32.mrf.mxu0  ;;  %v2004_v4 = vpop.f32.mrf.mxu1 }
 0x11a   : > { %v2862_v17 = vadd.f32 %v927_v56, %v635_v2 }
 0x11b   : > { %v1954_v30 = vpop.f32.mrf.mxu0  ;;  %v937_v35 = vpop.f32.mrf.mxu1 }
 0x11c   : > { %v2864_v46 = vadd.f32 %v2004_v4, %v1954_v30 }
 0x11d   : > { %v645_v63 = vpop.f32.mrf.mxu0  ;;  %v2059_v1 = vpop.f32.mrf.mxu1 }
 0x11e   : > { %v2866_v19 = vadd.f32 %v937_v35, %v645_v63 }
 0x11f   : > { %v2009_v7 = vpop.f32.mrf.mxu0  ;;  %v1287_v51 = vpop.f32.mrf.mxu1 }
 0x120   : > { %v1181_v28 = vadd.f32 %v2009_v7, %v2802_v34 }
 0x121   : > { %v1021_v10 = vpop.f32.mrf.mxu0  ;;  %v2062_v11 = vpop.f32.mrf.mxu1 }
 0x122   : > { %v1180_v16 = vadd.f32 %v1021_v10, %v788_v14  ;;  %v1447_v59 = vadd.f32 %v2059_v1, %v1181_v28 }
 0x123   : > { %v2012_v23 = vpop.f32.mrf.mxu0  ;;  %v1297_v26 = vpop.f32.mrf.mxu1 }
 0x124   : > { %v1446_v40 = vadd.f32 %v1287_v51, %v1180_v16  ;;  %v1183_v20 = vadd.f32 %v2012_v23, %v2806_v44 }
 0x125   : > { %v1031_v41 = vpop.f32.mrf.mxu0  ;;  %v2065_v48 = vpop.f32.mrf.mxu1 }
 0x126   : > { %1478 = vxpose.xlu0.b32.start [1/16] (narrow) %v1446_v40, 8  ;;  %v1182_v3 = vadd.f32 %v1031_v41, %v2808_v50  ;;  %v1449_v2 = vadd.f32 %v2062_v11, %v1183_v20 }
 0x127   : > { %v2015_v49 = vpop.f32.mrf.mxu0  ;;  %v1307_v53 = vpop.f32.mrf.mxu1 }
 0x128   : > { %v1448_v29 = vadd.f32 %v1297_v26, %v1182_v3  ;;  %v1185_v1 = vadd.f32 %v2015_v49, %v2810_v55 }
 0x129   : > { %v1041_v6 = vpop.f32.mrf.mxu0  ;;  %v2068_v13 = vpop.f32.mrf.mxu1 }
 0x12a   : > { %1479 = vxpose.xlu0.b32.cont [2/16] (narrow) %v1447_v59, 8  ;;  %v1184_v4 = vadd.f32 %v1041_v6, %v2812_v0  ;;  %v1451_v16 = vadd.f32 %v2065_v48, %v1185_v1  ;;  %v868_v48 = vadd.f32 %v2834_v43, %v2838_v58 }
 0x12b   : > { %v2018_v32 = vpop.f32.mrf.mxu0  ;;  %v1317_v36 = vpop.f32.mrf.mxu1 }
 0x12c   : > { %v1450_v7 = vadd.f32 %v1307_v53, %v1184_v4  ;;  %v1187_v55 = vadd.f32 %v2018_v32, %v2814_v8 }
 0x12d   : > { %v1051_v37 = vpop.f32.mrf.mxu0  ;;  %v2071_v45 = vpop.f32.mrf.mxu1 }
 0x12e   : > { %1480 = vxpose.xlu0.b32.cont [3/16] (narrow) %v1448_v29, 8  ;;  %v1186_v23 = vadd.f32 %v1051_v37, %v2816_v15  ;;  %v1453_v59 = vadd.f32 %v2068_v13, %v1187_v55 }
 0x12f   : > { %v2021_v34 = vpop.f32.mrf.mxu0  ;;  %v1327_v56 = vpop.f32.mrf.mxu1 }
 0x130   : > { %v1452_v40 = vadd.f32 %v1317_v36, %v1186_v23  ;;  %v1189_v37 = vadd.f32 %v2021_v34, %v2818_v22 }
 0x131   : > { %v1061_v30 = vpop.f32.mrf.mxu0  ;;  %v2074_v35 = vpop.f32.mrf.mxu1 }
 0x132   : > { %1481 = vxpose.xlu0.b32.cont [4/16] (narrow) %v1449_v2, 8  ;;  %v1188_v15 = vadd.f32 %v1061_v30, %v2820_v38  ;;  %v1455_v1 = vadd.f32 %v2071_v45, %v1189_v37 }
 0x133   : > { %v2024_v50 = vpop.f32.mrf.mxu0  ;;  %v1337_v63 = vpop.f32.mrf.mxu1 }
 0x134   : > { %v1454_v2 = vadd.f32 %v1327_v56, %v1188_v15  ;;  %v1191_v22 = vadd.f32 %v2024_v50, %v2822_v54 }
 0x135   : > { %v1071_v51 = vpop.f32.mrf.mxu0  ;;  %v2875_v14 = vpop.f32.mrf.mxu1 }
 0x136   : > { %1482 = vxpose.xlu0.b32.cont [5/16] (narrow) %v1450_v7, 8  ;;  %v1190_v43 = vadd.f32 %v1071_v51, %v2824_v61  ;;  %v1457_v45 = vadd.f32 %v2074_v35, %v1191_v22 }
 0x137   : > { %v2027_v44 = vpop.f32.mrf.mxu0  ;;  %v1347_v10 = vpop.f32.mrf.mxu1 }
 0x138   : > { %v1456_v34 = vadd.f32 %v1337_v63, %v1190_v43  ;;  %v1193_v54 = vadd.f32 %v2027_v44, %v2826_v5 }
 0x139   : > { %v1081_v11 = vpop.f32.mrf.mxu0  ;;  %v2878_v26 = vpop.f32.mrf.mxu1 }
 0x13a   : > { %1483 = vxpose.xlu0.b32.cont [6/16] (narrow) %v1451_v16, 8  ;;  %v1192_v61 = vadd.f32 %v1081_v11, %v2828_v31  ;;  %v1459_v35 = vadd.f32 %v2875_v14, %v1193_v54 }
 0x13b   : > { %v2880_v0 = vpop.f32.mrf.mxu0  ;;  %v2882_v28 = vpop.f32.mrf.mxu1 }
 0x13c   : > { %v1458_v50 = vadd.f32 %v1347_v10, %v1192_v61  ;;  %v1195_v5 = vadd.f32 %v2880_v0, %v2830_v62 }
 0x13d   : > { %v1091_v41 = vpop.f32.mrf.mxu0  ;;  %v2083_v53 = vpop.f32.mrf.mxu1 }
 0x13e   : > { %1484 = vxpose.xlu0.b32.cont [7/16] (narrow) %v1452_v40, 8  ;;  %v1194_v31 = vadd.f32 %v1091_v41, %v2832_v18  ;;  %v1461_v18 = vadd.f32 %v2878_v26, %v1195_v5 }
 0x13f   : > { %v2033_v49 = vpop.f32.mrf.mxu0  ;;  %v1367_v20 = vpop.f32.mrf.mxu1 }
 0x140   : > { %v1197_v8 = vadd.f32 %v2033_v49, %v2836_v47 }
 0x141   : > { %v1101_v3 = vpop.f32.mrf.mxu0  ;;  %v2086_v4 = vpop.f32.mrf.mxu1 }
 0x142   : > { %v1196_v6 = vadd.f32 %v1101_v3, %v868_v48  ;;  %1485 = vxpose.xlu0.b32.cont [8/16] (narrow) %v1453_v59, 8  ;;  %v1463_v58 = vadd.f32 %v2083_v53, %v1197_v8 }
 0x143   : > { %v2036_v29 = vpop.f32.mrf.mxu0  ;;  %v1377_v30 = vpop.f32.mrf.mxu1 }
 0x144   : > { %v1462_v32 = vadd.f32 %v1367_v20, %v1196_v6  ;;  %v1199_v47 = vadd.f32 %v2036_v29, %v2840_v27 }
 0x145   : > { %v1111_v36 = vpop.f32.mrf.mxu0  ;;  %v2089_v16 = vpop.f32.mrf.mxu1 }
 0x146   : > { %1486 = vxpose.xlu0.b32.cont [9/16] (narrow) %v1454_v2, 8  ;;  %1510 = vxpose.xlu1.b32.start [1/16] (narrow) %v1462_v32, 8  ;;  %v1198_v38 = vadd.f32 %v1111_v36, %v2842_v12  ;;  %v1465_v51 = vadd.f32 %v2086_v4, %v1199_v47 }
 0x147   : > { %v2039_v13 = vpop.f32.mrf.mxu0  ;;  %v1387_v55 = vpop.f32.mrf.mxu1 }
 0x148   : > { %v1464_v56 = vadd.f32 %v1377_v30, %v1198_v38  ;;  %v1201_v27 = vadd.f32 %v2039_v13, %v2844_v24  ;;  %v1460_v24 = vadd.f32 %v2882_v28, %v1194_v31 }
 0x149   : > { %v1121_v7 = vpop.f32.mrf.mxu0  ;;  %v2092_v49 = vpop.f32.mrf.mxu1 }
 0x14a   : > { %1487 = vxpose.xlu0.b32.cont [10/16] (narrow) %v1455_v1, 8  ;;  %1511 = vxpose.xlu1.b32.cont [2/16] (narrow) %v1463_v58, 8  ;;  %v1200_v12 = vadd.f32 %v1121_v7, %v2846_v33  ;;  %v1467_v11 = vadd.f32 %v2089_v16, %v1201_v27 }
 0x14b   : > { %v2042_v23 = vpop.f32.mrf.mxu0  ;;  %v1397_v48 = vpop.f32.mrf.mxu1 }
 0x14c   : > { %v1466_v63 = vadd.f32 %v1387_v55, %v1200_v12  ;;  %v1203_v44 = vadd.f32 %v2042_v23, %v2848_v42 }
 0x14d   : > { %v1131_v40 = vpop.f32.mrf.mxu0  ;;  %v2095_v15 = vpop.f32.mrf.mxu1 }
 0x14e   : > { %1488 = vxpose.xlu0.b32.cont [11/16] (narrow) %v1456_v34, 8  ;;  %1512 = vxpose.xlu1.b32.cont [3/16] (narrow) %v1464_v56, 8  ;;  %v1202_v33 = vadd.f32 %v1131_v40, %v2850_v52  ;;  %v1469_v14 = vadd.f32 %v2092_v49, %v1203_v44 }
 0x14f   : > { %v2045_v53 = vpop.f32.mrf.mxu0  ;;  %v1407_v3 = vpop.f32.mrf.mxu1 }
 0x150   : > { %v1468_v10 = vadd.f32 %v1397_v48, %v1202_v33  ;;  %v1205_v62 = vadd.f32 %v2045_v53, %v2852_v60 }
 0x151   : > { %v1141_v59 = vpop.f32.mrf.mxu0  ;;  %v2098_v6 = vpop.f32.mrf.mxu1 }
 0x152   : > { %1489 = vxpose.xlu0.b32.cont [12/16] (narrow) %v1457_v45, 8  ;;  %1513 = vxpose.xlu1.b32.cont [4/16] (narrow) %v1465_v51, 8  ;;  %v1204_v52 = vadd.f32 %v1141_v59, %v2854_v9  ;;  %v1471_v42 = vadd.f32 %v2095_v15, %v1205_v62 }
 0x153   : > { %v2048_v41 = vpop.f32.mrf.mxu0  ;;  %v1417_v37 = vpop.f32.mrf.mxu1 }
 0x154   : > { %v1470_v0 = vadd.f32 %v1407_v3, %v1204_v52  ;;  %v1207_v26 = vadd.f32 %v2048_v41, %v2856_v21 }
 0x155   : > { %v1151_v28 = vpop.f32.mrf.mxu0  ;;  %v2101_v8 = vpop.f32.mrf.mxu1 }
 0x156   : > { %1490 = vxpose.xlu0.b32.cont [13/16] (narrow) %v1458_v50, 8  ;;  %1514 = vxpose.xlu1.b32.cont [5/16] (narrow) %v1466_v63, 8  ;;  %v1206_v20 = vadd.f32 %v1151_v28, %v2858_v39  ;;  %v1473_v32 = vadd.f32 %v2098_v6, %v1207_v26 }
 0x157   : > { %v2051_v29 = vpop.f32.mrf.mxu0  ;;  %v1427_v4 = vpop.f32.mrf.mxu1 }
 0x158   : > { %v1472_v2 = vadd.f32 %v1417_v37, %v1206_v20  ;;  %v1209_v1 = vadd.f32 %v2051_v29, %v2860_v57  ;;  %v1546_v57 = vpop.permute.xlu1 %1545 }
 0x159   : > { %v1161_v9 = vpop.f32.mrf.mxu0  ;;  %v2104_v58 = vpop.f32.mrf.mxu1 }
 0x15a   : > { %1491 = vxpose.xlu0.b32.cont [14/16] (narrow) %v1459_v35, 8  ;;  %1515 = vxpose.xlu1.b32.cont [6/16] (narrow) %v1467_v11, 8  ;;  %v1208_v36 = vadd.f32 %v1161_v9, %v2862_v17  ;;  %v1475_v38 = vadd.f32 %v2101_v8, %v1209_v1 }
 0x15b   : > { %v2054_v60 = vpop.f32.mrf.mxu0  ;;  %v1437_v13 = vpop.f32.mrf.mxu1 }
 0x15c   : > { %v1474_v43 = vadd.f32 %v1427_v4, %v1208_v36  ;;  %v1211_v30 = vadd.f32 %v2054_v60, %v2864_v46 }
 0x15d   : > { %v1171_v39 = vpop.f32.mrf.mxu0 }
 0x15e   : > { %1492 = vxpose.xlu0.b32.cont [15/16] (narrow) %v1460_v24, 8  ;;  %1516 = vxpose.xlu1.b32.cont [7/16] (narrow) %v1468_v10, 8  ;;  %v1210_v21 = vadd.f32 %v1171_v39, %v2866_v19  ;;  %v1477_v17 = vadd.f32 %v2104_v58, %v1211_v30 }
 0x160   : > { %v1476_v22 = vadd.f32 %v1437_v13, %v1210_v21 }
 0x162   : > { %1493 = vxpose.xlu0.b32.end [16/16] (narrow) %v1461_v18, 8  ;;  %1517 = vxpose.xlu1.b32.cont [8/16] (narrow) %v1469_v14, 8 }
 0x166   : > { %1518 = vxpose.xlu1.b32.cont [9/16] (narrow) %v1470_v0, 8 }
 0x16a   : > { %1519 = vxpose.xlu1.b32.cont [10/16] (narrow) %v1471_v42, 8 }
 0x16e   : > { %1520 = vxpose.xlu1.b32.cont [11/16] (narrow) %v1472_v2, 8 }
 0x172   : > { %1521 = vxpose.xlu1.b32.cont [12/16] (narrow) %v1473_v32, 8 }
 0x176   : > { %1522 = vxpose.xlu1.b32.cont [13/16] (narrow) %v1474_v43, 8 }
 0x17a   : > { %1523 = vxpose.xlu1.b32.cont [14/16] (narrow) %v1475_v38, 8 }
 0x17e   : > { %1524 = vxpose.xlu1.b32.cont [15/16] (narrow) %v1476_v22, 8 }
 0x182   : > { %1525 = vxpose.xlu1.b32.end [16/16] (narrow) %v1477_v17, 8 }
 0x18b   : > { %2147 = vset.pattern.permute.xlu0 %v2210_v25 }
 0x1a2   : > { %v1494_v34 = vpop.trf.xlu0 }
 0x1a3   : > { %v1548_v47 = vadd.f32 %v1546_v57, %v1494_v34 }
 0x1a5   : > { %1550 = vst [vmem:[%s163_s20] sm:$0xff] %v1548_v47 }
 0x1c2   : > { %v1526_v19 = vpop.trf.xlu1 }
 0x1c3   : > { %v1549_v56 = vadd.f32 %v1546_v57, %v1526_v19 }
 0x1c5   : > { %1551 = vst [vmem:[%s163_s20 + $0x8] sm:$0xff] %v1549_v56 }
 0x1c6   : > { %2161 = shalt.err (!%p2158_p3)
}
 0x1c7   : > { %s2162_s16 = scalar_lea.hbm %s1565_s28, 256  ;;  %s2166_s9 = scalar_lea.hbm %s2952_s3, 512 }
 0x1c8   : > { %p2163_p4 = scmp.ne.s32.totalorder %s1565_s28, %s2162_s16  ;;  %p2167_p9 = scmp.lt.s32.totalorder %s1565_s28, %s2952_s3 }
 0x1c9   : > { %p2168_p10 = scmp.lt.s32.totalorder %s2166_s9, %s2162_s16 }
 0x1ca   : > { %p2164_p7 = pnand %p2163_p4, %p2270_p5 }
 0x1cb   : > { %p2169_p11 = por %p2168_p10, %p2167_p9 }
 0x1cc   : > { %p2165_p8 = pneg %p2164_p7 }
 0x1ce   : > { %p2170_p12 = pnand %p2169_p11, %p2165_p8 }
 0x1d0   : > { %2173 = shalt.err (!%p2170_p12)
}
 0x1d1   : > { %2106 = dma.vmem_to_hbm [thread:$0]  (%p2270_p5), %s1568_s25, 256, %s1565_s28, %s1553_s29  }
 0x1d2 PF: > { %p2112_p13 = scmp.ge.s32.totalorder %s2208_s15, 2  ;;  %s1579_s17 = sand.u32 1, %s2196_s12  }
 0x1d3   : > { %s1580_s19 = scalar_lea.sflag [#allocation3], %s1579_s17 }
 0x1d4   : > { %p2109_p0 = pnand %p2112_p13, %p2274_p6 }
 0x1d6   : > { %p2110_p1 = pneg %p2109_p0 }
 0x1d8   : > { %2191 = dma.done.wait (%p2110_p1), %s1580_s19, 256  }
 0x1d9   : > { %2193 = vsyncadd (%p2110_p1), %s1580_s19, 4294967040  ;;  %p13_p2 = scmp.ge.s32.totalorder %s2257_s18, 4   ;;  %s2971_s12 = smov %s2200_s13 }
 0x1da   : > { %s2972_s13 = smov %s2204_s14  ;;  %s2973_s14 = smov %s2268_s21 }
 0x1db   : > { %s2974_s15 = smov %s2257_s18  ;;  %15 = sbr.rel (!%p13_p2) target bundleno = 3 (0x3), region = 70 }
 0x1e0   :  { %1585 = vsyncpa [#allocation3], 1 }
 0x1e1   :  { %1587 = vsyncpa [#allocation3 + $0x1], 1 }

</bundles_post_ra>
